<compile_context>
chip_gen: v7x
topology: tpu7x:2x2x1
jax: 0.10.0
libtpu: 0.0.40
codegen_flags: <defaults>
</compile_context>

<pallas_src>
import functools

import jax
import jax.numpy as jnp
from jax.experimental import pallas as pl
from jax.experimental.pallas import tpu as pltpu

IN_DIM = 1280            # fixed by nn.Linear(1280, hidden_dim)
EPS = 1e-5               # nn.LayerNorm default eps
_NUM_TC = 2              # worst-case TensorCores sharing the "parallel" axis (v7x)


def _cdiv(a, b):
    return -(-a // b)


def _round_up(x, m):
    return (x + m - 1) // m * m


def _vmem_budget_bytes():
    # Generation-aware budget: ~70% of per-core VMEM (v5e/v6e: 128 MiB, v7x: 64 MiB).
    try:
        cap = int(pltpu.get_tpu_info().vmem_capacity_bytes)
    except Exception:
        cap = 64 << 20          # conservative fallback (v7x per-core VMEM)
    return max(16 << 20, int(cap * 0.7))


def _vmem_estimate_bytes(bm, H, O, x_bytes, mm_bytes, out_bytes):
    x_tiles = 2 * bm * IN_DIM * x_bytes                    # double-buffered streamed x tile
    out_tiles = 2 * bm * O * out_bytes                     # double-buffered output tile
    weights = (IN_DIM * H + H * H + H * O) * mm_bytes      # resident, single copy
    small = 7 * max(H, O) * 4                              # biases + LN params (f32)
    temps = (bm * IN_DIM * mm_bytes                        # in-kernel x cast
             + 3 * bm * H * 4                              # f32 activations / LN temporaries
             + bm * O * 4)                                 # f32 fc3 accumulator
    return x_tiles + out_tiles + weights + small + temps


def _choose_block_m(N, requested, H, O, x_bytes, mm_bytes, out_bytes, budget):
    # 1) clamp to (8-row-rounded) batch, multiple of 8 rows.
    bm = min(requested, _round_up(N, 8))
    bm = max(8, (bm // 8) * 8)
    # 2) shrink until the tile fits the VMEM budget.
    while bm > 8 and _vmem_estimate_bytes(bm, H, O, x_bytes, mm_bytes, out_bytes) > budget:
        bm = max(8, ((bm // 2) // 8) * 8)
    # 3) core balance: the ("parallel",) grid axis is sharded across v7x's 2
    #    TensorCores -> prefer an even step count (>=4 for large batches) so
    #    neither core idles or gets 2x the work.  Only ever shrinks bm.
    if N >= 256:
        min_steps = 2 * _NUM_TC if N >= 1024 else _NUM_TC
        steps = max(min_steps, _cdiv(N, bm))
        if steps % _NUM_TC:
            steps += _NUM_TC - (steps % _NUM_TC)
        bm = max(8, _round_up(_cdiv(N, steps), 8))
    return bm


def _layernorm_f32(h, gamma, beta):
    # Two-pass statistics (PyTorch-parity; safer than E[h^2]-E[h]^2 in f32).
    mu = jnp.mean(h, axis=-1, keepdims=True)
    d = h - mu
    var = jnp.mean(d * d, axis=-1, keepdims=True)
    return d * jax.lax.rsqrt(var + EPS) * gamma + beta


def layernormnet_kernel(x_ref,
                        w1_ref, b1_ref, g1_ref, be1_ref,
                        w2_ref, b2_ref, g2_ref, be2_ref,
                        w3_ref, b3_ref,
                        o_ref):
    # Cast the streamed x tile to the matmul dtype in VMEM (no HBM copy).
    x = x_ref[...].astype(w1_ref.dtype)

    # fc1 -> ln1 -> (dropout: identity in eval) -> relu
    h = jnp.dot(x, w1_ref[...], preferred_element_type=jnp.float32) + b1_ref[...]
    h = _layernorm_f32(h, g1_ref[...], be1_ref[...])
    h = jnp.maximum(h, 0.0).astype(w2_ref.dtype)

    # fc2 -> ln2 -> (dropout: identity in eval) -> relu
    h = jnp.dot(h, w2_ref[...], preferred_element_type=jnp.float32) + b2_ref[...]
    h = _layernorm_f32(h, g2_ref[...], be2_ref[...])
    h = jnp.maximum(h, 0.0).astype(w3_ref.dtype)

    # fc3
    out = jnp.dot(h, w3_ref[...], preferred_element_type=jnp.float32) + b3_ref[...]
    o_ref[...] = out.astype(o_ref.dtype)


def prepare_params(params, matmul_dtype=jnp.bfloat16):
    """One-time cast: matmul weights -> matmul_dtype, biases/LN params -> f32 (1, F)."""
    w1, b1, g1, be1, w2, b2, g2, be2, w3, b3 = params
    mm = lambda w: jnp.asarray(w, matmul_dtype)
    f32 = lambda a: jnp.asarray(a, jnp.float32).reshape(1, -1)
    return (mm(w1), f32(b1), f32(g1), f32(be1),
            mm(w2), f32(b2), f32(g2), f32(be2),
            mm(w3), f32(b3))


@functools.partial(jax.jit, static_argnames=("block_m", "out_dtype"))
def layernormnet_forward(x, prepared_params, block_m=512, out_dtype=None):
    N, D = x.shape
    assert D == IN_DIM
    (w1, b1, g1, be1, w2, b2, g2, be2, w3, b3) = prepared_params
    H = w1.shape[1]
    O = w3.shape[1]
    out_dtype = x.dtype if out_dtype is None else out_dtype

    x_bytes = jnp.dtype(x.dtype).itemsize
    mm_bytes = jnp.dtype(w1.dtype).itemsize
    out_bytes = jnp.dtype(out_dtype).itemsize

    budget = _vmem_budget_bytes()
    bm = _choose_block_m(N, block_m, H, O, x_bytes, mm_bytes, out_bytes, budget)
    est = _vmem_estimate_bytes(bm, H, O, x_bytes, mm_bytes, out_bytes)
    # Request only what we actually need (+margin); don't starve compiler scratch.
    vmem_limit = int(min(budget, max(est + est // 2 + (2 << 20), 16 << 20)))

    grid = (_cdiv(N, bm),)   # ragged last block: Pallas masks out-of-bounds writes

    # Grid-invariant operands: whole-array VMEM residency (single copy,
    # no per-step pipeline double-buffering).
    resident = pl.BlockSpec(memory_space=pltpu.MemorySpace.VMEM)

    out = pl.pallas_call(
        layernormnet_kernel,
        out_shape=jax.ShapeDtypeStruct((N, O), out_dtype),
        grid_spec=pltpu.PrefetchScalarGridSpec(
            num_scalar_prefetch=0,
            grid=grid,
            in_specs=[
                pl.BlockSpec((bm, IN_DIM), lambda i: (i, 0)),   # x tile (pipelined)
                resident, resident, resident, resident,          # fc1, ln1
                resident, resident, resident, resident,          # fc2, ln2
                resident, resident,                               # fc3
            ],
            out_specs=pl.BlockSpec((bm, O), lambda i: (i, 0)),
        ),
        compiler_params=pltpu.CompilerParams(
            dimension_semantics=("parallel",),
            vmem_limit_bytes=vmem_limit,
        ),
    )(x, w1, b1, g1, be1, w2, b2, g2, be2, w3, b3)

    return out


def init_params(key, hidden_dim, out_dim, dtype=jnp.float32):
    ks = jax.random.split(key, 6)
    scale1 = 1.0 / jnp.sqrt(IN_DIM)
    scaleh = 1.0 / jnp.sqrt(hidden_dim)
    w1 = jax.random.uniform(ks[0], (IN_DIM, hidden_dim), dtype, -scale1, scale1)
    b1 = jax.random.uniform(ks[1], (1, hidden_dim), dtype, -scale1, scale1)
    g1 = jnp.ones((1, hidden_dim), dtype)
    be1 = jnp.zeros((1, hidden_dim), dtype)
    w2 = jax.random.uniform(ks[2], (hidden_dim, hidden_dim), dtype, -scaleh, scaleh)
    b2 = jax.random.uniform(ks[3], (1, hidden_dim), dtype, -scaleh, scaleh)
    g2 = jnp.ones((1, hidden_dim), dtype)
    be2 = jnp.zeros((1, hidden_dim), dtype)
    w3 = jax.random.uniform(ks[4], (hidden_dim, out_dim), dtype, -scaleh, scaleh)
    b3 = jax.random.uniform(ks[5], (1, out_dim), dtype, -scaleh, scaleh)
    return (w1, b1, g1, be1, w2, b2, g2, be2, w3, b3)


def reference_forward(x, params, matmul_dtype=jnp.float32):
    w1, b1, g1, be1, w2, b2, g2, be2, w3, b3 = params

    def ln(h, g, b):
        mu = jnp.mean(h, -1, keepdims=True)
        var = jnp.mean((h - mu) ** 2, -1, keepdims=True)
        return (h - mu) / jnp.sqrt(var + EPS) * g + b

    def dot(a, w):
        return jnp.dot(a.astype(matmul_dtype), w.astype(matmul_dtype),
                       preferred_element_type=jnp.float32)

    h = jnp.maximum(ln(dot(x, w1) + b1, g1, be1), 0.0)
    h = jnp.maximum(ln(dot(h, w2) + b2, g2, be2), 0.0)
    return dot(h, w3) + b3


if __name__ == "__main__":
    # TODO(synk): nn.Dropout(p=0.1) is stochastic in train mode; eval-mode
    # (identity) semantics are implemented, matching module.eval().
    hidden_dim, out_dim = 128, 128
    key = jax.random.PRNGKey(0)
    kx, kp = jax.random.split(key)
    params = init_params(kp, hidden_dim, out_dim)

    # Case 1: small demo batch (single grid step).
    x_small = jax.random.normal(kx, (16, IN_DIM), jnp.float32)
    # Case 2: batch not a multiple of the tile -> exercises the ragged last
    # block (masked writes) and the multi-step / core-balanced grid.
    x_odd = jax.random.normal(jax.random.fold_in(kx, 1), (300, IN_DIM), jnp.float32)

    # (a) exact-semantics check: f32 matmuls vs PyTorch-equivalent reference.
    p_f32 = prepare_params(params, matmul_dtype=jnp.float32)
    out_f32 = jax.block_until_ready(layernormnet_forward(x_small, p_f32, block_m=512))
    ref_f32 = reference_forward(x_small, params, matmul_dtype=jnp.float32)
    assert out_f32.shape == (16, out_dim)
    assert jnp.allclose(out_f32, ref_f32, atol=2e-4, rtol=2e-4)

    # (b) performance configuration: bf16 matmuls with f32 accumulation/LN/ReLU,
    #     x streamed uncast, ragged batch handled in-grid.
    p_bf16 = prepare_params(params, matmul_dtype=jnp.bfloat16)
    for x in (x_small, x_odd):
        out = jax.block_until_ready(layernormnet_forward(x, p_bf16, block_m=512))
        assert out.shape == (x.shape[0], out_dim)
        ref_bf = reference_forward(x, params, matmul_dtype=jnp.bfloat16)
        assert jnp.allclose(out, ref_bf, atol=2e-2, rtol=2e-2)

    # (c) bf16 output writeback path (downstream-accepts-bf16 option).
    out_bf16 = jax.block_until_ready(
        layernormnet_forward(x_odd, p_bf16, block_m=512, out_dtype=jnp.bfloat16))
    assert out_bf16.shape == (x_odd.shape[0], out_dim) and out_bf16.dtype == jnp.bfloat16

    print("KERNEL_OK")
</pallas_src>

<mosaic_0001>
module attributes {stable_mosaic.version = 11 : i64} {
  func.func @layernormnet_kernel(%arg0: i32, %arg1: memref<16x1280xf32, #tpu.memory_space<vmem>>, %arg2: memref<1280x128xf32, #tpu.memory_space<vmem>>, %arg3: memref<1x128xf32, #tpu.memory_space<vmem>>, %arg4: memref<1x128xf32, #tpu.memory_space<vmem>>, %arg5: memref<1x128xf32, #tpu.memory_space<vmem>>, %arg6: memref<128x128xf32, #tpu.memory_space<vmem>>, %arg7: memref<1x128xf32, #tpu.memory_space<vmem>>, %arg8: memref<1x128xf32, #tpu.memory_space<vmem>>, %arg9: memref<1x128xf32, #tpu.memory_space<vmem>>, %arg10: memref<128x128xf32, #tpu.memory_space<vmem>>, %arg11: memref<1x128xf32, #tpu.memory_space<vmem>>, %arg12: memref<16x128xf32, #tpu.memory_space<vmem>>) attributes {dimension_semantics = [#tpu.dimension_semantics<parallel>], iteration_bounds = array<i64: 1>, scalar_prefetch = 0 : i64, scratch_operands = 0 : i64, tpu.core_type = #tpu.core_type<tc>, window_params = [{transform_indices = @transform_0, window_bounds = array<i64: 16, 1280>}, {pipeline_mode = #tpu.pipeline_mode<synchronous>, transform_indices = @transform_1, window_bounds = array<i64: 1280, 128>}, {pipeline_mode = #tpu.pipeline_mode<synchronous>, transform_indices = @transform_2, window_bounds = array<i64: 1, 128>}, {pipeline_mode = #tpu.pipeline_mode<synchronous>, transform_indices = @transform_3, window_bounds = array<i64: 1, 128>}, {pipeline_mode = #tpu.pipeline_mode<synchronous>, transform_indices = @transform_4, window_bounds = array<i64: 1, 128>}, {pipeline_mode = #tpu.pipeline_mode<synchronous>, transform_indices = @transform_5, window_bounds = array<i64: 128, 128>}, {pipeline_mode = #tpu.pipeline_mode<synchronous>, transform_indices = @transform_6, window_bounds = array<i64: 1, 128>}, {pipeline_mode = #tpu.pipeline_mode<synchronous>, transform_indices = @transform_7, window_bounds = array<i64: 1, 128>}, {pipeline_mode = #tpu.pipeline_mode<synchronous>, transform_indices = @transform_8, window_bounds = array<i64: 1, 128>}, {pipeline_mode = #tpu.pipeline_mode<synchronous>, transform_indices = @transform_9, window_bounds = array<i64: 128, 128>}, {pipeline_mode = #tpu.pipeline_mode<synchronous>, transform_indices = @transform_10, window_bounds = array<i64: 1, 128>}, {transform_indices = @transform_11, window_bounds = array<i64: 16, 128>}]} {
    %c0 = arith.constant 0 : index
    %c0_0 = arith.constant 0 : index
    %0 = vector.load %arg1[%c0, %c0_0] : memref<16x1280xf32, #tpu.memory_space<vmem>>, vector<16x1280xf32>
    %c0_1 = arith.constant 0 : index
    %c0_2 = arith.constant 0 : index
    %1 = vector.load %arg2[%c0_1, %c0_2] : memref<1280x128xf32, #tpu.memory_space<vmem>>, vector<1280x128xf32>
    %cst = arith.constant dense<0.000000e+00> : vector<16x128xf32>
    %2 = tpu.matmul %0, %1, %cst {dimension_numbers = #tpu.dot_dimension_numbers<[1], [0], [0], [1], [0, 0, 1, 1], [], []>} : vector<16x1280xf32>, vector<1280x128xf32>, vector<16x128xf32> -> vector<16x128xf32>
    %c0_3 = arith.constant 0 : index
    %c0_4 = arith.constant 0 : index
    %3 = vector.load %arg3[%c0_3, %c0_4] : memref<1x128xf32, #tpu.memory_space<vmem>>, vector<1x128xf32>
    %4 = vector.broadcast %3 : vector<1x128xf32> to vector<16x128xf32>
    %5 = arith.addf %2, %4 : vector<16x128xf32>
    %c0_5 = arith.constant 0 : index
    %c0_6 = arith.constant 0 : index
    %6 = vector.load %arg4[%c0_5, %c0_6] : memref<1x128xf32, #tpu.memory_space<vmem>>, vector<1x128xf32>
    %c0_7 = arith.constant 0 : index
    %c0_8 = arith.constant 0 : index
    %7 = vector.load %arg5[%c0_7, %c0_8] : memref<1x128xf32, #tpu.memory_space<vmem>>, vector<1x128xf32>
    %cst_9 = arith.constant dense<0.000000e+00> : vector<16xf32>
    %8 = vector.multi_reduction <add>, %5, %cst_9 [1] : vector<16x128xf32> to vector<16xf32>
    %9 = vector.shape_cast %8 : vector<16xf32> to vector<16x1xf32>
    %cst_10 = arith.constant 1.280000e+02 : f32
    %10 = vector.broadcast %cst_10 : f32 to vector<16x1xf32>
    %11 = arith.divf %9, %10 : vector<16x1xf32>
    %12 = vector.broadcast %11 : vector<16x1xf32> to vector<16x128xf32>
    %13 = arith.subf %5, %12 : vector<16x128xf32>
    %14 = arith.mulf %13, %13 : vector<16x128xf32>
    %cst_11 = arith.constant dense<0.000000e+00> : vector<16xf32>
    %15 = vector.multi_reduction <add>, %14, %cst_11 [1] : vector<16x128xf32> to vector<16xf32>
    %16 = vector.shape_cast %15 : vector<16xf32> to vector<16x1xf32>
    %cst_12 = arith.constant 1.280000e+02 : f32
    %17 = vector.broadcast %cst_12 : f32 to vector<16x1xf32>
    %18 = arith.divf %16, %17 : vector<16x1xf32>
    %cst_13 = arith.constant 9.99999974E-6 : f32
    %19 = vector.broadcast %cst_13 : f32 to vector<16x1xf32>
    %20 = arith.addf %18, %19 : vector<16x1xf32>
    %21 = math.rsqrt %20 : vector<16x1xf32>
    %22 = vector.broadcast %21 : vector<16x1xf32> to vector<16x128xf32>
    %23 = arith.mulf %13, %22 : vector<16x128xf32>
    %24 = vector.broadcast %6 : vector<1x128xf32> to vector<16x128xf32>
    %25 = arith.mulf %23, %24 : vector<16x128xf32>
    %26 = vector.broadcast %7 : vector<1x128xf32> to vector<16x128xf32>
    %27 = arith.addf %25, %26 : vector<16x128xf32>
    %cst_14 = arith.constant 0.000000e+00 : f32
    %28 = vector.broadcast %cst_14 : f32 to vector<16x128xf32>
    %29 = arith.maximumf %27, %28 : vector<16x128xf32>
    %c0_15 = arith.constant 0 : index
    %c0_16 = arith.constant 0 : index
    %30 = vector.load %arg6[%c0_15, %c0_16] : memref<128x128xf32, #tpu.memory_space<vmem>>, vector<128x128xf32>
    %cst_17 = arith.constant dense<0.000000e+00> : vector<16x128xf32>
    %31 = tpu.matmul %29, %30, %cst_17 {dimension_numbers = #tpu.dot_dimension_numbers<[1], [0], [0], [1], [0, 0, 1, 1], [], []>} : vector<16x128xf32>, vector<128x128xf32>, vector<16x128xf32> -> vector<16x128xf32>
    %c0_18 = arith.constant 0 : index
    %c0_19 = arith.constant 0 : index
    %32 = vector.load %arg7[%c0_18, %c0_19] : memref<1x128xf32, #tpu.memory_space<vmem>>, vector<1x128xf32>
    %33 = vector.broadcast %32 : vector<1x128xf32> to vector<16x128xf32>
    %34 = arith.addf %31, %33 : vector<16x128xf32>
    %c0_20 = arith.constant 0 : index
    %c0_21 = arith.constant 0 : index
    %35 = vector.load %arg8[%c0_20, %c0_21] : memref<1x128xf32, #tpu.memory_space<vmem>>, vector<1x128xf32>
    %c0_22 = arith.constant 0 : index
    %c0_23 = arith.constant 0 : index
    %36 = vector.load %arg9[%c0_22, %c0_23] : memref<1x128xf32, #tpu.memory_space<vmem>>, vector<1x128xf32>
    %cst_24 = arith.constant dense<0.000000e+00> : vector<16xf32>
    %37 = vector.multi_reduction <add>, %34, %cst_24 [1] : vector<16x128xf32> to vector<16xf32>
    %38 = vector.shape_cast %37 : vector<16xf32> to vector<16x1xf32>
    %cst_25 = arith.constant 1.280000e+02 : f32
    %39 = vector.broadcast %cst_25 : f32 to vector<16x1xf32>
    %40 = arith.divf %38, %39 : vector<16x1xf32>
    %41 = vector.broadcast %40 : vector<16x1xf32> to vector<16x128xf32>
    %42 = arith.subf %34, %41 : vector<16x128xf32>
    %43 = arith.mulf %42, %42 : vector<16x128xf32>
    %cst_26 = arith.constant dense<0.000000e+00> : vector<16xf32>
    %44 = vector.multi_reduction <add>, %43, %cst_26 [1] : vector<16x128xf32> to vector<16xf32>
    %45 = vector.shape_cast %44 : vector<16xf32> to vector<16x1xf32>
    %cst_27 = arith.constant 1.280000e+02 : f32
    %46 = vector.broadcast %cst_27 : f32 to vector<16x1xf32>
    %47 = arith.divf %45, %46 : vector<16x1xf32>
    %cst_28 = arith.constant 9.99999974E-6 : f32
    %48 = vector.broadcast %cst_28 : f32 to vector<16x1xf32>
    %49 = arith.addf %47, %48 : vector<16x1xf32>
    %50 = math.rsqrt %49 : vector<16x1xf32>
    %51 = vector.broadcast %50 : vector<16x1xf32> to vector<16x128xf32>
    %52 = arith.mulf %42, %51 : vector<16x128xf32>
    %53 = vector.broadcast %35 : vector<1x128xf32> to vector<16x128xf32>
    %54 = arith.mulf %52, %53 : vector<16x128xf32>
    %55 = vector.broadcast %36 : vector<1x128xf32> to vector<16x128xf32>
    %56 = arith.addf %54, %55 : vector<16x128xf32>
    %cst_29 = arith.constant 0.000000e+00 : f32
    %57 = vector.broadcast %cst_29 : f32 to vector<16x128xf32>
    %58 = arith.maximumf %56, %57 : vector<16x128xf32>
    %c0_30 = arith.constant 0 : index
    %c0_31 = arith.constant 0 : index
    %59 = vector.load %arg10[%c0_30, %c0_31] : memref<128x128xf32, #tpu.memory_space<vmem>>, vector<128x128xf32>
    %cst_32 = arith.constant dense<0.000000e+00> : vector<16x128xf32>
    %60 = tpu.matmul %58, %59, %cst_32 {dimension_numbers = #tpu.dot_dimension_numbers<[1], [0], [0], [1], [0, 0, 1, 1], [], []>} : vector<16x128xf32>, vector<128x128xf32>, vector<16x128xf32> -> vector<16x128xf32>
    %c0_33 = arith.constant 0 : index
    %c0_34 = arith.constant 0 : index
    %61 = vector.load %arg11[%c0_33, %c0_34] : memref<1x128xf32, #tpu.memory_space<vmem>>, vector<1x128xf32>
    %62 = vector.broadcast %61 : vector<1x128xf32> to vector<16x128xf32>
    %63 = arith.addf %60, %62 : vector<16x128xf32>
    %c0_35 = arith.constant 0 : index
    %c0_36 = arith.constant 0 : index
    %64 = vector.load %arg12[%c0_35, %c0_36] : memref<16x128xf32, #tpu.memory_space<vmem>>, vector<16x128xf32>
    tpu.vector_store %arg12[%c0_35, %c0_36], %63 {strides = array<i32>} : memref<16x128xf32, #tpu.memory_space<vmem>>, vector<16x128xf32>,
    return
  }
  func.func @transform_0(%arg0: i32) -> (i32, i32) {
    %c0_i32 = arith.constant 0 : i32
    %c0_i32_0 = arith.constant 0 : i32
    return %arg0, %c0_i32 : i32, i32
  }
  func.func @transform_1(%arg0: i32) -> (i32, i32) {
    %c0_i32 = arith.constant 0 : i32
    %c0_i32_0 = arith.constant 0 : i32
    %c0_i32_1 = arith.constant 0 : i32
    return %c0_i32, %c0_i32_0 : i32, i32
  }
  func.func @transform_2(%arg0: i32) -> (i32, i32) {
    %c0_i32 = arith.constant 0 : i32
    %c0_i32_0 = arith.constant 0 : i32
    %c0_i32_1 = arith.constant 0 : i32
    return %c0_i32, %c0_i32_0 : i32, i32
  }
  func.func @transform_3(%arg0: i32) -> (i32, i32) {
    %c0_i32 = arith.constant 0 : i32
    %c0_i32_0 = arith.constant 0 : i32
    %c0_i32_1 = arith.constant 0 : i32
    return %c0_i32, %c0_i32_0 : i32, i32
  }
  func.func @transform_4(%arg0: i32) -> (i32, i32) {
    %c0_i32 = arith.constant 0 : i32
    %c0_i32_0 = arith.constant 0 : i32
    %c0_i32_1 = arith.constant 0 : i32
    return %c0_i32, %c0_i32_0 : i32, i32
  }
  func.func @transform_5(%arg0: i32) -> (i32, i32) {
    %c0_i32 = arith.constant 0 : i32
    %c0_i32_0 = arith.constant 0 : i32
    %c0_i32_1 = arith.constant 0 : i32
    return %c0_i32, %c0_i32_0 : i32, i32
  }
  func.func @transform_6(%arg0: i32) -> (i32, i32) {
    %c0_i32 = arith.constant 0 : i32
    %c0_i32_0 = arith.constant 0 : i32
    %c0_i32_1 = arith.constant 0 : i32
    return %c0_i32, %c0_i32_0 : i32, i32
  }
  func.func @transform_7(%arg0: i32) -> (i32, i32) {
    %c0_i32 = arith.constant 0 : i32
    %c0_i32_0 = arith.constant 0 : i32
    %c0_i32_1 = arith.constant 0 : i32
    return %c0_i32, %c0_i32_0 : i32, i32
  }
  func.func @transform_8(%arg0: i32) -> (i32, i32) {
    %c0_i32 = arith.constant 0 : i32
    %c0_i32_0 = arith.constant 0 : i32
    %c0_i32_1 = arith.constant 0 : i32
    return %c0_i32, %c0_i32_0 : i32, i32
  }
  func.func @transform_9(%arg0: i32) -> (i32, i32) {
    %c0_i32 = arith.constant 0 : i32
    %c0_i32_0 = arith.constant 0 : i32
    %c0_i32_1 = arith.constant 0 : i32
    return %c0_i32, %c0_i32_0 : i32, i32
  }
  func.func @transform_10(%arg0: i32) -> (i32, i32) {
    %c0_i32 = arith.constant 0 : i32
    %c0_i32_0 = arith.constant 0 : i32
    %c0_i32_1 = arith.constant 0 : i32
    return %c0_i32, %c0_i32_0 : i32, i32
  }
  func.func @transform_11(%arg0: i32) -> (i32, i32) {
    %c0_i32 = arith.constant 0 : i32
    %c0_i32_0 = arith.constant 0 : i32
    return %arg0, %c0_i32 : i32, i32
  }
}

</mosaic_0001>

<bundles_post_ra>
// kernel: layernormnet_forward.1
= control target key start
LH: loop header
LB: loop body
LE: loop exit
PB: predicated region body
PF: predicated region fallthrough
CT: control target
= control target key end

     0   :  { %16 = vsyncpa [#allocation3], 0  ;;  %s1789_s0 = inlined_call_operand.hbm [shape: f32[16,1280], index: 0, kind: input, shape index: {}]   ;;  %s1790_s1 = inlined_call_operand.hbm [shape: f32[1280,128], index: 1, kind: input, shape index: {}]   ;;  %s1791_s2 = inlined_call_operand.vmem [shape: f32[1,128], index: 2, kind: input, shape index: {}]   ;;  %s1792_s3 = inlined_call_operand.vmem [shape: f32[1,128], index: 3, kind: input, shape index: {}]   ;;  %s1793_s4 = inlined_call_operand.vmem [shape: f32[1,128], index: 4, kind: input, shape index: {}]   ;;  %s1794_s5 = inlined_call_operand.hbm [shape: f32[128,128], index: 5, kind: input, shape index: {}]   ;;  %s1795_s6 = inlined_call_operand.vmem [shape: f32[1,128], index: 6, kind: input, shape index: {}]   ;;  %s1796_s7 = inlined_call_operand.vmem [shape: f32[1,128], index: 7, kind: input, shape index: {}]   ;;  %s1797_s8 = inlined_call_operand.vmem [shape: f32[1,128], index: 8, kind: input, shape index: {}]   ;;  %s1798_s9 = inlined_call_operand.hbm [shape: f32[128,128], index: 9, kind: input, shape index: {}]   ;;  %s1799_s10 = inlined_call_operand.vmem [shape: f32[1,128], index: 10, kind: input, shape index: {}]   ;;  %s1800_s11 = inlined_call_operand.hbm [shape: f32[16,128], index: 11, kind: output, shape index: {}]  }
   0x1   :  { %17 = vsyncpa [#allocation6], 0 }
   0x2   :  { %18 = vsyncpa [#allocation9], 0 }
   0x3   :  { %19 = vsyncpa [#allocation4], 0  ;;  %s1620_s17 = smov [#allocation5]   ;;  %s1502_s21 = scalar_lea.hbm %s1790_s1, 20480 }
   0x4   :  { %s37_s18 = sshll.u32 %s1620_s17, 4  ;;  %p1503_p0 = scmp.ne.s32.totalorder %s1790_s1, %s1502_s21  ;;  %s38_s18 = int_to_ptr.vmem [resolvable:$true] %s37_s18 }
   0x5   :  { %p1506_p1 = scmp.lt.u32.totalorder %s1502_s21, %s1790_s1 }
   0x7   :  { %p1508_p2 = pnand %p1506_p1, %p1503_p0 }
   0x9   :  { %1511 = shalt.err (!%p1508_p2)
}
   0xa   :  { %s1512_s26 = scalar_lea.vmem %s38_s18, 20480  ;;  %p1517_p4 = scmp.lt.s32.totalorder %s38_s18, %s38_s18 }
   0xb   :  { %p1513_p3 = scmp.ne.s32.totalorder %s38_s18, %s1512_s26  ;;  %p1518_p5 = scmp.lt.s32.totalorder %s1512_s26, %s1512_s26 }
   0xd   :  { %p1519_p6 = por %p1518_p5, %p1517_p4 }
   0xf   :  { %p1520_p7 = pnand %p1519_p6, %p1513_p3 }
  0x11   :  { %1523 = shalt.err (!%p1520_p7)
}
  0x12   :  { %s1621_s27 = smov 128   ;;  %s1622_s28 = smov 8  }
  0x13   :  { %43 = dma.hbm_to_vmem [thread:$0]  %s1790_s1, 20480, %s38_s18, [#allocation6], %s1621_s27, %s1621_s27, %s1622_s28  }
  0x14   :  { %s1623_s12 = smov [#allocation2]   ;;  %s1524_s16 = scalar_lea.hbm %s1789_s0, 2560 }
  0x15   :  { %s25_s13 = sshll.u32 %s1623_s12, 4  ;;  %p1525_p8 = scmp.ne.s32.totalorder %s1789_s0, %s1524_s16  ;;  %s26_s13 = int_to_ptr.vmem [resolvable:$true] %s25_s13 }
  0x16   :  { %p1528_p9 = scmp.lt.u32.totalorder %s1524_s16, %s1789_s0 }
  0x18   :  { %p1530_p10 = pnand %p1528_p9, %p1525_p8 }
  0x1a   :  { %1533 = shalt.err (!%p1530_p10)
}
  0x1b   :  { %s1534_s22 = scalar_lea.vmem %s26_s13, 2560  ;;  %p1539_p12 = scmp.lt.s32.totalorder %s26_s13, %s26_s13 }
  0x1c   :  { %p1535_p11 = scmp.ne.s32.totalorder %s26_s13, %s1534_s22  ;;  %p1540_p13 = scmp.lt.s32.totalorder %s1534_s22, %s1534_s22 }
  0x1e   :  { %p1541_p0 = por %p1540_p13, %p1539_p12 }
  0x20   :  { %p1542_p1 = pnand %p1541_p0, %p1535_p11 }
  0x22   :  { %1545 = shalt.err (!%p1542_p1)
}
  0x23   :  { %s1624_s1 = smov 1280   ;;  %s1625_s18 = smov 80  }
  0x24   :  { %31 = dma.hbm_to_vmem [thread:$0]  %s1789_s0, 2560, %s26_s13, [#allocation3], %s1624_s1, %s1624_s1, %s1625_s18  }
  0x25   :  { %s1626_s25 = smov [#allocation7]   ;;  %s1627_s29 = smov [#allocation8]  }
  0x26   :  { %s55_s26 = sshll.u32 %s1626_s25, 4  ;;  %s73_s30 = sshll.u32 %s1627_s29, 4  ;;  %s56_s26 = int_to_ptr.vmem [resolvable:$true] %s55_s26  ;;  %s1716_s30 = int_to_ptr.vmem [resolvable:$true] %s73_s30 }
  0x27   :  { %s1546_s15 = scalar_lea.hbm %s1794_s5, 2048 }
  0x28   :  { %p1547_p2 = scmp.ne.s32.totalorder %s1794_s5, %s1546_s15  ;;  %p1550_p3 = scmp.lt.u32.totalorder %s1546_s15, %s1794_s5 }
  0x2a   :  { %p1552_p4 = pnand %p1550_p3, %p1547_p2 }
  0x2c   :  { %1555 = shalt.err (!%p1552_p4)
}
  0x2d   :  { %s1556_s0 = scalar_lea.vmem %s56_s26, 2048  ;;  %p1561_p6 = scmp.lt.s32.totalorder %s56_s26, %s56_s26 }
  0x2e   :  { %p1557_p5 = scmp.ne.s32.totalorder %s56_s26, %s1556_s0  ;;  %p1562_p7 = scmp.lt.s32.totalorder %s1556_s0, %s1556_s0 }
  0x30   :  { %p1563_p8 = por %p1562_p7, %p1561_p6 }
  0x32   :  { %p1564_p9 = pnand %p1563_p8, %p1557_p5 }
  0x34   :  { %1567 = shalt.err (!%p1564_p9)
}
  0x35   :  { %61 = dma.hbm_to_vmem [thread:$0]  %s1794_s5, 2048, %s56_s26, [#allocation6], %s1621_s27, %s1621_s27, %s1622_s28  }
  0x36   :  { %s1568_s18 = scalar_lea.hbm %s1798_s9, 2048 }
  0x37   :  { %p1569_p10 = scmp.ne.s32.totalorder %s1798_s9, %s1568_s18  ;;  %p1572_p11 = scmp.lt.u32.totalorder %s1568_s18, %s1798_s9 }
  0x39   :  { %p1574_p12 = pnand %p1572_p11, %p1569_p10 }
  0x3b   :  { %1577 = shalt.err (!%p1574_p12)
}
  0x3c   :  { %s1578_s12 = scalar_lea.vmem %s1716_s30, 2048  ;;  %p1583_p0 = scmp.lt.s32.totalorder %s1716_s30, %s1716_s30 }
  0x3d   :  { %p1579_p13 = scmp.ne.s32.totalorder %s1716_s30, %s1578_s12  ;;  %p1584_p1 = scmp.lt.s32.totalorder %s1578_s12, %s1578_s12 }
  0x3f   :  { %p1585_p2 = por %p1584_p1, %p1583_p0 }
  0x41   :  { %p1586_p3 = pnand %p1585_p2, %p1579_p13 }
  0x43   :  { %1589 = shalt.err (!%p1586_p3)
}
  0x44   :  { %79 = dma.hbm_to_vmem [thread:$0]  %s1798_s9, 2048, %s1716_s30, [#allocation9], %s1621_s27, %s1621_s27, %s1622_s28  }
  0x45   :  { %1612 = dma.done.wait [#allocation3], 2560  }
  0x46   :  { %1613 = vsyncadd [#allocation3], 4294964736 }
  0x47   :  { %1614 = dma.done.wait [#allocation6], 22528  }
  0x48   :  { %1615 = vsyncadd [#allocation6], 4294944768 }
  0x49   :  { %1616 = dma.done.wait [#allocation9], 2048  }
  0x4a   :  { %1617 = vsyncadd [#allocation9], 4294965248  ;;  %v130_v0 = vld [vmem:[#allocation5 + $0x80] sm:$0xff]  ;;  %v131_v1 = vld [vmem:[#allocation5 + $0x88] sm:$0xff] }
  0x4b   :  { %v114_v2 = vld [vmem:[#allocation5] sm:$0xff]  ;;  %v1261_v3 = vpack.c.bf16 %v131_v1, %v130_v0  ;;  %v115_v4 = vld [vmem:[#allocation5 + $0x8] sm:$0xff]  ;;  %v132_v11 = vld [vmem:[#allocation5 + $0x90] sm:$0xff] }
  0x4c   :  { %v162_v5 = vld [vmem:[#allocation5 + $0x180] sm:$0xff]  ;;  %v163_v6 = vld [vmem:[#allocation5 + $0x188] sm:$0xff]  ;;  %v1263_v7 = vpack.c.bf16 %v115_v4, %v114_v2  ;;  %v133_v13 = vld [vmem:[#allocation5 + $0x98] sm:$0xff] }
  0x4d   :  { %v1293_v8 = vpack.c.bf16 %v163_v6, %v162_v5  ;;  %v146_v9 = vld [vmem:[#allocation5 + $0x100] sm:$0xff]  ;;  %v147_v10 = vld [vmem:[#allocation5 + $0x108] sm:$0xff]  ;;  %1262 = vmatprep.subr.bf16.mxu0 %v1261_v3  ;;  %v116_v14 = vld [vmem:[#allocation5 + $0x10] sm:$0xff]  ;;  %v1265_v16 = vpack.c.bf16 %v133_v13, %v132_v11 }
  0x4e   :  { %v1295_v12 = vpack.c.bf16 %v147_v10, %v146_v9  ;;  %v117_v15 = vld [vmem:[#allocation5 + $0x18] sm:$0xff]  ;;  %1264 = vmatpush3.bf16.msra.mxu0 %v1263_v7  ;;  %v164_v18 = vld [vmem:[#allocation5 + $0x190] sm:$0xff]  ;;  %v134_v23 = vld [vmem:[#allocation5 + $0xa0] sm:$0xff] }
  0x4f   :  { %1294 = vmatprep.subr.bf16.mxu1 %v1293_v8  ;;  %v1267_v17 = vpack.c.bf16 %v117_v15, %v116_v14  ;;  %v165_v19 = vld [vmem:[#allocation5 + $0x198] sm:$0xff]  ;;  %v148_v20 = vld [vmem:[#allocation5 + $0x110] sm:$0xff]  ;;  %v135_v24 = vld [vmem:[#allocation5 + $0xa8] sm:$0xff]  ;;  %1266 = vmatprep.subr.bf16.mxu0 %v1265_v16 }
  0x50   :  { %1296 = vmatpush3.bf16.msra.mxu1 %v1295_v12  ;;  %v1297_v21 = vpack.c.bf16 %v165_v19, %v164_v18  ;;  %v149_v22 = vld [vmem:[#allocation5 + $0x118] sm:$0xff]  ;;  %v1269_v26 = vpack.c.bf16 %v135_v24, %v134_v23  ;;  %v118_v27 = vld [vmem:[#allocation5 + $0x20] sm:$0xff]  ;;  %v119_v28 = vld [vmem:[#allocation5 + $0x28] sm:$0xff] }
  0x51   :  { %v1299_v25 = vpack.c.bf16 %v149_v22, %v148_v20  ;;  %v166_v29 = vld [vmem:[#allocation5 + $0x1a0] sm:$0xff]  ;;  %v167_v30 = vld [vmem:[#allocation5 + $0x1a8] sm:$0xff]  ;;  %v1271_v33 = vpack.c.bf16 %v119_v28, %v118_v27  ;;  %v136_v35 = vld [vmem:[#allocation5 + $0xb0] sm:$0xff] }
  0x52   :  { %1298 = vmatprep.subr.bf16.mxu1 %v1297_v21  ;;  %v150_v31 = vld [vmem:[#allocation5 + $0x120] sm:$0xff]  ;;  %v151_v32 = vld [vmem:[#allocation5 + $0x128] sm:$0xff]  ;;  %1268 = vmatpush3.bf16.msra.mxu0 %v1267_v17  ;;  %v1301_v34 = vpack.c.bf16 %v167_v30, %v166_v29  ;;  %v137_v36 = vld [vmem:[#allocation5 + $0xb8] sm:$0xff] }
  0x53   :  { %v120_v37 = vld [vmem:[#allocation5 + $0x30] sm:$0xff]  ;;  %1270 = vmatprep.subr.bf16.mxu0 %v1269_v26  ;;  %v1303_v38 = vpack.c.bf16 %v151_v32, %v150_v31  ;;  %v1273_v39 = vpack.c.bf16 %v137_v36, %v136_v35  ;;  %v121_v40 = vld [vmem:[#allocation5 + $0x38] sm:$0xff]  ;;  %v138_v46 = vld [vmem:[#allocation5 + $0xc0] sm:$0xff] }
  0x54   :  { %1300 = vmatpush3.bf16.msra.mxu1 %v1299_v25  ;;  %v168_v41 = vld [vmem:[#allocation5 + $0x1b0] sm:$0xff]  ;;  %v169_v42 = vld [vmem:[#allocation5 + $0x1b8] sm:$0xff]  ;;  %v139_v47 = vld [vmem:[#allocation5 + $0xc8] sm:$0xff]  ;;  %v1275_v48 = vpack.c.bf16 %v121_v40, %v120_v37 }
  0x55   :  { %1302 = vmatprep.subr.bf16.mxu1 %v1301_v34  ;;  %v1305_v43 = vpack.c.bf16 %v169_v42, %v168_v41  ;;  %v152_v44 = vld [vmem:[#allocation5 + $0x130] sm:$0xff]  ;;  %v153_v45 = vld [vmem:[#allocation5 + $0x138] sm:$0xff]  ;;  %v170_v49 = vld [vmem:[#allocation5 + $0x1c0] sm:$0xff]  ;;  %v1277_v52 = vpack.c.bf16 %v139_v47, %v138_v46 }
  0x56   :  { %1272 = vmatpush3.bf16.msra.mxu0 %v1271_v33  ;;  %v171_v50 = vld [vmem:[#allocation5 + $0x1c8] sm:$0xff]  ;;  %v1307_v51 = vpack.c.bf16 %v153_v45, %v152_v44  ;;  %v122_v53 = vld [vmem:[#allocation5 + $0x40] sm:$0xff]  ;;  %v140_v58 = vld [vmem:[#allocation5 + $0xd0] sm:$0xff] }
  0x57   :  { %1274 = vmatprep.subr.bf16.mxu0 %v1273_v39  ;;  %v123_v54 = vld [vmem:[#allocation5 + $0x48] sm:$0xff]  ;;  %v154_v55 = vld [vmem:[#allocation5 + $0x140] sm:$0xff]  ;;  %v1309_v56 = vpack.c.bf16 %v171_v50, %v170_v49  ;;  %v141_v59 = vld [vmem:[#allocation5 + $0xd8] sm:$0xff] }
  0x58   :  { %1304 = vmatpush3.bf16.msra.mxu1 %v1303_v38  ;;  %v155_v57 = vld [vmem:[#allocation5 + $0x148] sm:$0xff]  ;;  %v172_v60 = vld [vmem:[#allocation5 + $0x1d0] sm:$0xff]  ;;  %v173_v61 = vld [vmem:[#allocation5 + $0x1d8] sm:$0xff]  ;;  %v1279_v62 = vpack.c.bf16 %v123_v54, %v122_v53  ;;  %v1281_v0 = vpack.c.bf16 %v141_v59, %v140_v58 }
  0x59   :  { %1306 = vmatprep.subr.bf16.mxu1 %v1305_v43  ;;  %v1311_v63 = vpack.c.bf16 %v155_v57, %v154_v55  ;;  %v124_v1 = vld [vmem:[#allocation5 + $0x50] sm:$0xff]  ;;  %v125_v2 = vld [vmem:[#allocation5 + $0x58] sm:$0xff]  ;;  %v1313_v4 = vpack.c.bf16 %v173_v61, %v172_v60  ;;  %v142_v6 = vld [vmem:[#allocation5 + $0xe0] sm:$0xff] }
  0x5a   :  { %1276 = vmatpush3.bf16.msra.mxu0 %v1275_v48  ;;  %v156_v3 = vld [vmem:[#allocation5 + $0x150] sm:$0xff]  ;;  %v157_v5 = vld [vmem:[#allocation5 + $0x158] sm:$0xff]  ;;  %v143_v7 = vld [vmem:[#allocation5 + $0xe8] sm:$0xff]  ;;  %v1283_v10 = vpack.c.bf16 %v125_v2, %v124_v1 }
  0x5b   :  { %1278 = vmatprep.subr.bf16.mxu0 %v1277_v52  ;;  %v174_v8 = vld [vmem:[#allocation5 + $0x1e0] sm:$0xff]  ;;  %v175_v9 = vld [vmem:[#allocation5 + $0x1e8] sm:$0xff]  ;;  %v1315_v13 = vpack.c.bf16 %v157_v5, %v156_v3  ;;  %v1285_v14 = vpack.c.bf16 %v143_v7, %v142_v6  ;;  %v144_v19 = vld [vmem:[#allocation5 + $0xf0] sm:$0xff] }
  0x5c   :  { %1308 = vmatpush3.bf16.msra.mxu1 %v1307_v51  ;;  %v126_v11 = vld [vmem:[#allocation5 + $0x60] sm:$0xff]  ;;  %v95_v12 = vld [vmem:[#allocation2 + $0x8] sm:$0xff]  ;;  %v1317_v18 = vpack.c.bf16 %v175_v9, %v174_v8  ;;  %v145_v20 = vld [vmem:[#allocation5 + $0xf8] sm:$0xff] }
  0x5d   :  { %1310 = vmatprep.subr.bf16.mxu1 %v1309_v56  ;;  %v127_v15 = vld [vmem:[#allocation5 + $0x68] sm:$0xff]  ;;  %v158_v16 = vld [vmem:[#allocation5 + $0x160] sm:$0xff]  ;;  %345 = vmatprep.mubr.f32.mxu0 %v95_v12  ;;  %v97_v21 = vld [vmem:[#allocation2 + $0x18] sm:$0xff]  ;;  %v1289_v26 = vpack.c.bf16 %v145_v20, %v144_v19 }
  0x5e   :  { %1280 = vmatpush3.bf16.msra.mxu0 %v1279_v62  ;;  %v159_v17 = vld [vmem:[#allocation5 + $0x168] sm:$0xff]  ;;  %v176_v22 = vld [vmem:[#allocation5 + $0x1f0] sm:$0xff]  ;;  %v177_v23 = vld [vmem:[#allocation5 + $0x1f8] sm:$0xff]  ;;  %420 = vmatprep.mubr.f32.mxu1 %v97_v21  ;;  %v1287_v24 = vpack.c.bf16 %v127_v15, %v126_v11 }
  0x5f   :  { %1282 = vmatprep.subr.bf16.mxu0 %v1281_v0  ;;  %v1319_v25 = vpack.c.bf16 %v159_v17, %v158_v16  ;;  %v128_v27 = vld [vmem:[#allocation5 + $0x70] sm:$0xff]  ;;  %v129_v28 = vld [vmem:[#allocation5 + $0x78] sm:$0xff]  ;;  %v1321_v30 = vpack.c.bf16 %v177_v23, %v176_v22  ;;  %v194_v32 = vld [vmem:[#allocation5 + $0x280] sm:$0xff] }
  0x60   :  { %1312 = vmatpush3.bf16.msra.mxu1 %v1311_v63  ;;  %v160_v29 = vld [vmem:[#allocation5 + $0x170] sm:$0xff]  ;;  %v161_v31 = vld [vmem:[#allocation5 + $0x178] sm:$0xff]  ;;  %v195_v33 = vld [vmem:[#allocation5 + $0x288] sm:$0xff]  ;;  %v1291_v36 = vpack.c.bf16 %v129_v28, %v128_v27 }
  0x61   :  { %1314 = vmatprep.subr.bf16.mxu1 %v1313_v4  ;;  %v226_v34 = vld [vmem:[#allocation5 + $0x380] sm:$0xff]  ;;  %v227_v35 = vld [vmem:[#allocation5 + $0x388] sm:$0xff]  ;;  %v1323_v37 = vpack.c.bf16 %v161_v31, %v160_v29  ;;  %v1325_v38 = vpack.c.bf16 %v195_v33, %v194_v32  ;;  %v196_v44 = vld [vmem:[#allocation5 + $0x290] sm:$0xff] }
  0x62   :  { %1284 = vmatpush3.bf16.msra.mxu0 %v1283_v10  ;;  %v178_v39 = vld [vmem:[#allocation5 + $0x200] sm:$0xff]  ;;  %v179_v40 = vld [vmem:[#allocation5 + $0x208] sm:$0xff]  ;;  %v1357_v42 = vpack.c.bf16 %v227_v35, %v226_v34  ;;  %v197_v45 = vld [vmem:[#allocation5 + $0x298] sm:$0xff] }
  0x63   :  { %1286 = vmatprep.subr.bf16.mxu0 %v1285_v14  ;;  %v210_v41 = vld [vmem:[#allocation5 + $0x300] sm:$0xff]  ;;  %v211_v43 = vld [vmem:[#allocation5 + $0x308] sm:$0xff]  ;;  %v228_v46 = vld [vmem:[#allocation5 + $0x390] sm:$0xff]  ;;  %v1327_v49 = vpack.c.bf16 %v179_v40, %v178_v39  ;;  %v1329_v52 = vpack.c.bf16 %v197_v45, %v196_v44 }
  0x64   :  { %1316 = vmatpush3.bf16.msra.mxu1 %v1315_v13  ;;  %v229_v47 = vld [vmem:[#allocation5 + $0x398] sm:$0xff]  ;;  %v94_v48 = vld [vmem:[#allocation2] sm:$0xff]  ;;  %v96_v50 = vld [vmem:[#allocation2 + $0x10] sm:$0xff]  ;;  %v1359_v51 = vpack.c.bf16 %v211_v43, %v210_v41 }
  0x65   :  { %1318 = vmatprep.subr.bf16.mxu1 %v1317_v18  ;;  %v180_v53 = vld [vmem:[#allocation5 + $0x210] sm:$0xff]  ;;  %v181_v54 = vld [vmem:[#allocation5 + $0x218] sm:$0xff]  ;;  %v1361_v56 = vpack.c.bf16 %v229_v47, %v228_v46  ;;  %v198_v58 = vld [vmem:[#allocation5 + $0x2a0] sm:$0xff] }
  0x66   :  { %1288 = vmatpush3.bf16.msra.mxu0 %v1287_v24  ;;  %v212_v55 = vld [vmem:[#allocation5 + $0x310] sm:$0xff]  ;;  %v213_v57 = vld [vmem:[#allocation5 + $0x318] sm:$0xff]  ;;  %v199_v59 = vld [vmem:[#allocation5 + $0x2a8] sm:$0xff]  ;;  %v1331_v62 = vpack.c.bf16 %v181_v54, %v180_v53 }
  0x67   :  { %1290 = vmatprep.subr.bf16.mxu0 %v1289_v26  ;;  %v230_v60 = vld [vmem:[#allocation5 + $0x3a0] sm:$0xff]  ;;  %v231_v61 = vld [vmem:[#allocation5 + $0x3a8] sm:$0xff]  ;;  %v1363_v63 = vpack.c.bf16 %v213_v57, %v212_v55  ;;  %v1333_v0 = vpack.c.bf16 %v199_v59, %v198_v58  ;;  %v200_v6 = vld [vmem:[#allocation5 + $0x2b0] sm:$0xff] }
  0x68   :  { %1320 = vmatpush3.bf16.msra.mxu1 %v1319_v25  ;;  %v182_v1 = vld [vmem:[#allocation5 + $0x220] sm:$0xff]  ;;  %v183_v2 = vld [vmem:[#allocation5 + $0x228] sm:$0xff]  ;;  %v1365_v4 = vpack.c.bf16 %v231_v61, %v230_v60  ;;  %v201_v7 = vld [vmem:[#allocation5 + $0x2b8] sm:$0xff] }
  0x69   :  { %1322 = vmatprep.subr.bf16.mxu1 %v1321_v30  ;;  %v214_v3 = vld [vmem:[#allocation5 + $0x320] sm:$0xff]  ;;  %v215_v5 = vld [vmem:[#allocation5 + $0x328] sm:$0xff]  ;;  %v232_v8 = vld [vmem:[#allocation5 + $0x3b0] sm:$0xff]  ;;  %v1335_v10 = vpack.c.bf16 %v183_v2, %v182_v1  ;;  %v1337_v15 = vpack.c.bf16 %v201_v7, %v200_v6 }
  0x6a   :  { %1292 = vmatpush3.bf16.msra.mxu0 %v1291_v36  ;;  %v233_v9 = vld [vmem:[#allocation5 + $0x3b8] sm:$0xff]  ;;  %v184_v11 = vld [vmem:[#allocation5 + $0x230] sm:$0xff]  ;;  %v1367_v14 = vpack.c.bf16 %v215_v5, %v214_v3  ;;  %v202_v20 = vld [vmem:[#allocation5 + $0x2c0] sm:$0xff] }
  0x6b   :  { %1326 = vmatprep.subr.bf16.mxu0 %v1325_v38  ;;  %v185_v12 = vld [vmem:[#allocation5 + $0x238] sm:$0xff]  ;;  %v216_v16 = vld [vmem:[#allocation5 + $0x330] sm:$0xff]  ;;  %v1369_v19 = vpack.c.bf16 %v233_v9, %v232_v8  ;;  %v203_v21 = vld [vmem:[#allocation5 + $0x2c8] sm:$0xff] }
  0x6c   :  { %1324 = vmatpush3.bf16.msra.mxu1 %v1323_v37  ;;  %v105_v13 = vld [vmem:[#allocation2 + $0x58] sm:$0xff]  ;;  %v104_v18 = vld [vmem:[#allocation2 + $0x50] sm:$0xff]  ;;  %v107_v22 = vld [vmem:[#allocation2 + $0x68] sm:$0xff]  ;;  %v1339_v26 = vpack.c.bf16 %v185_v12, %v184_v11  ;;  %v1341_v30 = vpack.c.bf16 %v203_v21, %v202_v20 }
  0x6d   :  { %1358 = vmatprep.subr.bf16.mxu1 %v1357_v42  ;;  %346 = vmatmul.mubr.f32.vlgmr.msra.gmra.mrb[0].mxu0 %v94_v48  ;;  %v217_v17 = vld [vmem:[#allocation5 + $0x338] sm:$0xff]  ;;  %v234_v23 = vld [vmem:[#allocation5 + $0x3c0] sm:$0xff]  ;;  %v235_v24 = vld [vmem:[#allocation5 + $0x3c8] sm:$0xff] }
  0x6e   :  { %1328 = vmatpush3.bf16.msra.mxu0 %v1327_v49  ;;  %350 = vmatprep.mubr.f32.mxu0 %v105_v13  ;;  %v106_v25 = vld [vmem:[#allocation2 + $0x60] sm:$0xff]  ;;  %v99_v28 = vld [vmem:[#allocation2 + $0x28] sm:$0xff]  ;;  %v1371_v29 = vpack.c.bf16 %v217_v17, %v216_v16  ;;  %v1373_v34 = vpack.c.bf16 %v235_v24, %v234_v23  ;;  %v204_v35 = vld [vmem:[#allocation5 + $0x2d0] sm:$0xff] }
  0x6f   :  { %421 = vmatmul.mubr.f32.vlgmr.msra.gmra.mrb[0].mxu1 %v96_v50  ;;  %1330 = vmatprep.subr.bf16.mxu0 %v1329_v52  ;;  %v186_v27 = vld [vmem:[#allocation5 + $0x240] sm:$0xff]  ;;  %v187_v31 = vld [vmem:[#allocation5 + $0x248] sm:$0xff]  ;;  %v205_v36 = vld [vmem:[#allocation5 + $0x2d8] sm:$0xff] }
  0x70   :  { %1360 = vmatpush3.bf16.msra.mxu1 %v1359_v51  ;;  %425 = vmatprep.mubr.f32.mxu1 %v107_v22  ;;  %v218_v32 = vld [vmem:[#allocation5 + $0x340] sm:$0xff]  ;;  %v219_v33 = vld [vmem:[#allocation5 + $0x348] sm:$0xff]  ;;  %v101_v37 = vld [vmem:[#allocation2 + $0x38] sm:$0xff]  ;;  %v1343_v40 = vpack.c.bf16 %v187_v31, %v186_v27  ;;  %v1345_v42 = vpack.c.bf16 %v205_v36, %v204_v35 }
  0x71   :  { %1362 = vmatprep.subr.bf16.mxu1 %v1361_v56  ;;  %351 = vmatmul.mubr.f32.gmra.mrb[2].mxu0 %v104_v18  ;;  %v236_v38 = vld [vmem:[#allocation5 + $0x3d0] sm:$0xff]  ;;  %v237_v39 = vld [vmem:[#allocation5 + $0x3d8] sm:$0xff]  ;;  %v1375_v41 = vpack.c.bf16 %v219_v33, %v218_v32  ;;  %v206_v48 = vld [vmem:[#allocation5 + $0x2e0] sm:$0xff] }
  0x72   :  { %1332 = vmatpush3.bf16.msra.mxu0 %v1331_v62  ;;  %495 = vmatprep.mubr.f32.mxu0 %v99_v28  ;;  %v188_v43 = vld [vmem:[#allocation5 + $0x250] sm:$0xff]  ;;  %v189_v44 = vld [vmem:[#allocation5 + $0x258] sm:$0xff]  ;;  %v1377_v46 = vpack.c.bf16 %v237_v39, %v236_v38  ;;  %v207_v49 = vld [vmem:[#allocation5 + $0x2e8] sm:$0xff] }
  0x73   :  { %1334 = vmatprep.subr.bf16.mxu0 %v1333_v0  ;;  %426 = vmatmul.mubr.f32.gmra.mrb[2].mxu1 %v106_v25  ;;  %v220_v45 = vld [vmem:[#allocation5 + $0x350] sm:$0xff]  ;;  %v221_v47 = vld [vmem:[#allocation5 + $0x358] sm:$0xff]  ;;  %v238_v50 = vld [vmem:[#allocation5 + $0x3e0] sm:$0xff]  ;;  %v1347_v52 = vpack.c.bf16 %v189_v44, %v188_v43  ;;  %v1349_v54 = vpack.c.bf16 %v207_v49, %v206_v48 }
  0x74   :  { %1364 = vmatpush3.bf16.msra.mxu1 %v1363_v63  ;;  %570 = vmatprep.mubr.f32.mxu1 %v101_v37  ;;  %v239_v51 = vld [vmem:[#allocation5 + $0x3e8] sm:$0xff]  ;;  %v1379_v53 = vpack.c.bf16 %v221_v47, %v220_v45  ;;  %v190_v55 = vld [vmem:[#allocation5 + $0x260] sm:$0xff]  ;;  %v208_v60 = vld [vmem:[#allocation5 + $0x2f0] sm:$0xff] }
  0x75   :  { %1366 = vmatprep.subr.bf16.mxu1 %v1365_v4  ;;  %v191_v56 = vld [vmem:[#allocation5 + $0x268] sm:$0xff]  ;;  %v222_v57 = vld [vmem:[#allocation5 + $0x360] sm:$0xff]  ;;  %v1381_v58 = vpack.c.bf16 %v239_v51, %v238_v50  ;;  %v209_v61 = vld [vmem:[#allocation5 + $0x2f8] sm:$0xff] }
  0x76   :  { %1336 = vmatpush3.bf16.msra.mxu0 %v1335_v10  ;;  %v223_v59 = vld [vmem:[#allocation5 + $0x368] sm:$0xff]  ;;  %v240_v62 = vld [vmem:[#allocation5 + $0x3f0] sm:$0xff]  ;;  %v241_v63 = vld [vmem:[#allocation5 + $0x3f8] sm:$0xff]  ;;  %v1351_v0 = vpack.c.bf16 %v191_v56, %v190_v55  ;;  %v1353_v2 = vpack.c.bf16 %v209_v61, %v208_v60 }
  0x77   :  { %1338 = vmatprep.subr.bf16.mxu0 %v1337_v15  ;;  %v1383_v1 = vpack.c.bf16 %v223_v59, %v222_v57  ;;  %v192_v3 = vld [vmem:[#allocation5 + $0x270] sm:$0xff]  ;;  %v193_v4 = vld [vmem:[#allocation5 + $0x278] sm:$0xff]  ;;  %v1385_v6 = vpack.c.bf16 %v241_v63, %v240_v62  ;;  %v258_v8 = vld [vmem:[#allocation5 + $0x480] sm:$0xff] }
  0x78   :  { %1368 = vmatpush3.bf16.msra.mxu1 %v1367_v14  ;;  %v224_v5 = vld [vmem:[#allocation5 + $0x370] sm:$0xff]  ;;  %v225_v7 = vld [vmem:[#allocation5 + $0x378] sm:$0xff]  ;;  %v259_v9 = vld [vmem:[#allocation5 + $0x488] sm:$0xff]  ;;  %v1355_v10 = vpack.c.bf16 %v193_v4, %v192_v3 }
  0x79   :  { %1370 = vmatprep.subr.bf16.mxu1 %v1369_v19  ;;  %v1387_v11 = vpack.c.bf16 %v225_v7, %v224_v5  ;;  %v1389_v12 = vpack.c.bf16 %v259_v9, %v258_v8  ;;  %v242_v13 = vld [vmem:[#allocation5 + $0x400] sm:$0xff]  ;;  %v243_v14 = vld [vmem:[#allocation5 + $0x408] sm:$0xff]  ;;  %v260_v15 = vld [vmem:[#allocation5 + $0x490] sm:$0xff] }
  0x7a   :  { %1340 = vmatpush3.bf16.msra.mxu0 %v1339_v26  ;;  %v261_v16 = vld [vmem:[#allocation5 + $0x498] sm:$0xff]  ;;  %v98_v17 = vld [vmem:[#allocation2 + $0x20] sm:$0xff]  ;;  %v1391_v18 = vpack.c.bf16 %v243_v14, %v242_v13  ;;  %v100_v19 = vld [vmem:[#allocation2 + $0x30] sm:$0xff] }
  0x7b   :  { %1342 = vmatprep.subr.bf16.mxu0 %v1341_v30  ;;  %v1393_v20 = vpack.c.bf16 %v261_v16, %v260_v15  ;;  %v244_v21 = vld [vmem:[#allocation5 + $0x410] sm:$0xff]  ;;  %v245_v22 = vld [vmem:[#allocation5 + $0x418] sm:$0xff]  ;;  %v262_v24 = vld [vmem:[#allocation5 + $0x4a0] sm:$0xff] }
  0x7c   :  { %1372 = vmatpush3.bf16.msra.mxu1 %v1371_v29  ;;  %v109_v23 = vld [vmem:[#allocation2 + $0x78] sm:$0xff]  ;;  %v263_v25 = vld [vmem:[#allocation5 + $0x4a8] sm:$0xff]  ;;  %v108_v27 = vld [vmem:[#allocation2 + $0x70] sm:$0xff]  ;;  %v1395_v28 = vpack.c.bf16 %v245_v22, %v244_v21 }
  0x7d   :  { %1374 = vmatprep.subr.bf16.mxu1 %v1373_v34  ;;  %v111_v26 = vld [vmem:[#allocation2 + $0x88] sm:$0xff]  ;;  %v110_v29 = vld [vmem:[#allocation2 + $0x80] sm:$0xff]  ;;  %v1397_v30 = vpack.c.bf16 %v263_v25, %v262_v24  ;;  %v264_v33 = vld [vmem:[#allocation5 + $0x4b0] sm:$0xff] }
  0x7e   :  { %1344 = vmatpush3.bf16.msra.mxu0 %v1343_v40  ;;  %v246_v31 = vld [vmem:[#allocation5 + $0x420] sm:$0xff]  ;;  %v247_v32 = vld [vmem:[#allocation5 + $0x428] sm:$0xff]  ;;  %v265_v34 = vld [vmem:[#allocation5 + $0x4b8] sm:$0xff] }
  0x7f   :  { %1346 = vmatprep.subr.bf16.mxu0 %v1345_v42  ;;  %v103_v35 = vld [vmem:[#allocation2 + $0x48] sm:$0xff]  ;;  %v1399_v36 = vpack.c.bf16 %v247_v32, %v246_v31  ;;  %v1401_v37 = vpack.c.bf16 %v265_v34, %v264_v33  ;;  %v248_v38 = vld [vmem:[#allocation5 + $0x430] sm:$0xff]  ;;  %v249_v39 = vld [vmem:[#allocation5 + $0x438] sm:$0xff] }
  0x80   :  { %1376 = vmatpush3.bf16.msra.mxu1 %v1375_v41  ;;  %v266_v40 = vld [vmem:[#allocation5 + $0x4c0] sm:$0xff]  ;;  %v267_v41 = vld [vmem:[#allocation5 + $0x4c8] sm:$0xff]  ;;  %v1403_v42 = vpack.c.bf16 %v249_v39, %v248_v38  ;;  %v269_v47 = vld [vmem:[#allocation5 + $0x4d8] sm:$0xff] }
  0x81   :  { %1378 = vmatprep.subr.bf16.mxu1 %v1377_v46  ;;  %v1405_v43 = vpack.c.bf16 %v267_v41, %v266_v40  ;;  %v250_v44 = vld [vmem:[#allocation5 + $0x440] sm:$0xff]  ;;  %v251_v45 = vld [vmem:[#allocation5 + $0x448] sm:$0xff]  ;;  %v268_v46 = vld [vmem:[#allocation5 + $0x4d0] sm:$0xff] }
  0x82   :  { %1348 = vmatpush3.bf16.msra.mxu0 %v1347_v52  ;;  %v1407_v48 = vpack.c.bf16 %v251_v45, %v250_v44  ;;  %v1409_v49 = vpack.c.bf16 %v269_v47, %v268_v46  ;;  %v252_v50 = vld [vmem:[#allocation5 + $0x450] sm:$0xff]  ;;  %v253_v51 = vld [vmem:[#allocation5 + $0x458] sm:$0xff]  ;;  %v270_v52 = vld [vmem:[#allocation5 + $0x4e0] sm:$0xff] }
  0x83   :  { %1350 = vmatprep.subr.bf16.mxu0 %v1349_v54  ;;  %v1411_v54 = vpack.c.bf16 %v253_v51, %v252_v50  ;;  %v254_v56 = vld [vmem:[#allocation5 + $0x460] sm:$0xff]  ;;  %v255_v57 = vld [vmem:[#allocation5 + $0x468] sm:$0xff]  ;;  %v273_v59 = vld [vmem:[#allocation5 + $0x4f8] sm:$0xff] }
  0x84   :  { %1380 = vmatpush3.bf16.msra.mxu1 %v1379_v53  ;;  %v271_v53 = vld [vmem:[#allocation5 + $0x4e8] sm:$0xff]  ;;  %v1415_v60 = vpack.c.bf16 %v255_v57, %v254_v56  ;;  %v256_v62 = vld [vmem:[#allocation5 + $0x470] sm:$0xff]  ;;  %v257_v63 = vld [vmem:[#allocation5 + $0x478] sm:$0xff] }
  0x85   :  { %1382 = vmatprep.subr.bf16.mxu1 %v1381_v58  ;;  %v1413_v55 = vpack.c.bf16 %v271_v53, %v270_v52  ;;  %v272_v58 = vld [vmem:[#allocation5 + $0x4f0] sm:$0xff]  ;;  %v958_v5 = vld [vmem:[%s1791_s2] ss:$0 sm:$0xff]  ;;  %v700_v46 = vld [vmem:[#allocation7 + $0x8] sm:$0xff] }
  0x86   :  { %1352 = vmatpush3.bf16.msra.mxu0 %v1351_v0  ;;  %v1417_v61 = vpack.c.bf16 %v273_v59, %v272_v58  ;;  %v1419_v0 = vpack.c.bf16 %v257_v63, %v256_v62  ;;  %v112_v3 = vld [vmem:[#allocation2 + $0x90] sm:$0xff]  ;;  %v699_v45 = vld [vmem:[#allocation7] sm:$0xff]  ;;  %v706_v63 = vld [vmem:[#allocation7 + $0x38] sm:$0xff] }
  0x87   :  { %1354 = vmatprep.subr.bf16.mxu0 %v1353_v2  ;;  %v113_v2 = vld [vmem:[#allocation2 + $0x98] sm:$0xff]  ;;  %v701_v47 = vld [vmem:[#allocation7 + $0x10] sm:$0xff]  ;;  %v703_v59 = vld [vmem:[#allocation7 + $0x20] sm:$0xff] }
  0x88   :  { %1384 = vmatpush3.bf16.msra.mxu1 %v1383_v1  ;;  %v102_v1 = vld [vmem:[#allocation2 + $0x40] sm:$0xff]  ;;  %v705_v62 = vld [vmem:[#allocation7 + $0x30] sm:$0xff] }
  0x89   :  { %1386 = vmatprep.subr.bf16.mxu1 %v1385_v6 }
  0x8a   :  { %1356 = vmatpush3.bf16.msra.mxu0 %v1355_v10 }
  0x8b   :  { %1390 = vmatprep.subr.bf16.mxu0 %v1389_v12 }
  0x8c   :  { %1388 = vmatpush3.bf16.msra.mxu1 %v1387_v11 }
  0x8d   :  { %496 = vmatmul.mubr.f32.vlgmr.msra.gmra.mrb[4].mxu0 %v98_v17 }
  0x8e   :  { %1392 = vmatpush3.bf16.msra.mxu0 %v1391_v18  ;;  %500 = vmatprep.mubr.f32.mxu0 %v109_v23 }
  0x8f   :  { %571 = vmatmul.mubr.f32.vlgmr.msra.gmra.mrb[4].mxu1 %v100_v19  ;;  %1394 = vmatprep.subr.bf16.mxu0 %v1393_v20 }
  0x90   :  { %575 = vmatprep.mubr.f32.mxu1 %v111_v26 }
  0x91   :  { %501 = vmatmul.mubr.f32.gmra.mrb[6].mxu0 %v108_v27 }
  0x92   :  { %1396 = vmatpush3.bf16.msra.mxu0 %v1395_v28  ;;  %645 = vmatprep.mubr.f32.mxu0 %v103_v35 }
  0x93   :  { %576 = vmatmul.mubr.f32.gmra.mrb[6].mxu1 %v110_v29  ;;  %1398 = vmatprep.subr.bf16.mxu0 %v1397_v30 }
  0x96   :  { %1400 = vmatpush3.bf16.msra.mxu0 %v1399_v36 }
  0x97   :  { %1402 = vmatprep.subr.bf16.mxu0 %v1401_v37 }
  0x9a   :  { %1404 = vmatpush3.bf16.msra.mxu0 %v1403_v42 }
  0x9b   :  { %1406 = vmatprep.subr.bf16.mxu0 %v1405_v43 }
  0x9e   :  { %1408 = vmatpush3.bf16.msra.mxu0 %v1407_v48  ;;  %v1421_v48 = vpack.c.bf16 %v700_v46, %v699_v45 }
  0x9f   :  { %1410 = vmatprep.subr.bf16.mxu0 %v1409_v49  ;;  %v702_v49 = vld [vmem:[#allocation7 + $0x18] sm:$0xff] }
  0xa0   :  { %v1425_v50 = vpack.c.bf16 %v702_v49, %v701_v47  ;;  %1422 = vmatprep.subr.bf16.mxu1 %v1421_v48 }
  0xa1   :  { %1424 = vmatpush3.bf16.msra.mxu1 %v1421_v48 }
  0xa2   :  { %1412 = vmatpush3.bf16.msra.mxu0 %v1411_v54  ;;  %1426 = vmatprep.subr.bf16.mxu1 %v1425_v50 }
  0xa3   :  { %1414 = vmatprep.subr.bf16.mxu0 %v1413_v55 }
  0xa5   :  { %1428 = vmatpush3.bf16.msra.mxu1 %v1425_v50  ;;  %v843_v50 = vld [vmem:[#allocation8 + $0x20] sm:$0xff] }
  0xa6   :  { %1416 = vmatpush3.bf16.msra.mxu0 %v1415_v60  ;;  %v704_v60 = vld [vmem:[#allocation7 + $0x28] sm:$0xff] }
  0xa7   :  { %1418 = vmatprep.subr.bf16.mxu0 %v1417_v61  ;;  %v1429_v61 = vpack.c.bf16 %v704_v60, %v703_v59  ;;  %v850_v60 = vld [vmem:[#allocation8 + $0x58] sm:$0xff] }
  0xa9   :  { %1430 = vmatprep.subr.bf16.mxu1 %v1429_v61 }
  0xaa   :  { %1420 = vmatpush3.bf16.msra.mxu0 %v1419_v0  ;;  %1432 = vmatpush3.bf16.msra.mxu1 %v1429_v61  ;;  %v1433_v0 = vpack.c.bf16 %v706_v63, %v705_v62  ;;  %v851_v62 = vld [vmem:[#allocation8 + $0x60] sm:$0xff]  ;;  %v852_v63 = vld [vmem:[#allocation8 + $0x68] sm:$0xff] }
  0xac   :  { %1434 = vmatprep.subr.bf16.mxu1 %v1433_v0 }
  0xad   :  { %646 = vmatmul.mubr.f32.vlgmr.msra.gmra.mrb[8].mxu0 %v102_v1  ;;  %v707_v1 = vld [vmem:[#allocation7 + $0x40] sm:$0xff] }
  0xae   :  { %650 = vmatprep.mubr.f32.mxu0 %v113_v2  ;;  %1436 = vmatpush3.bf16.msra.mxu1 %v1433_v0  ;;  %v708_v2 = vld [vmem:[#allocation7 + $0x48] sm:$0xff]  ;;  %v1477_v0 = vpack.c.bf16 %v852_v63, %v851_v62 }
  0xb1   :  { %651 = vmatmul.mubr.f32.gmra.mrb[10].mxu0 %v112_v3  ;;  %v709_v3 = vld [vmem:[#allocation7 + $0x50] sm:$0xff] }
 0x140   :  { %v997_v4 = vpop.f32.mrb[0].mxu0 }
 0x141   :  { %v998_v6 = vpop.f32.mrb[1].mxu0 }
 0x142   :  { %v1035_v7 = vpop.f32.mrb[0].mxu1  ;;  %v999_v8 = vadd.f32 %v998_v6, %v997_v4  ;;  %v1437_v4 = vpack.c.bf16 %v708_v2, %v707_v1  ;;  %v853_v1 = vld [vmem:[#allocation8 + $0x70] sm:$0xff]  ;;  %v854_v2 = vld [vmem:[#allocation8 + $0x78] sm:$0xff] }
 0x143   :  { %v1036_v9 = vpop.f32.mrb[1].mxu1 }
 0x144   :  { %v1037_v10 = vadd.f32 %v1036_v9, %v1035_v7  ;;  %v348_v11 = vadd.f32 %v999_v8, %v958_v5  ;;  %v1000_v13 = vpop.f32.mrb[2].mxu0  ;;  %v711_v7 = vld [vmem:[#allocation7 + $0x60] sm:$0xff]  ;;  %v712_v8 = vld [vmem:[#allocation7 + $0x68] sm:$0xff]  ;;  %1438 = vmatprep.subr.bf16.mxu1 %v1437_v4 }
 0x145   :  { %v1001_v14 = vpop.f32.mrb[3].mxu0  ;;  %1440 = vmatpush3.bf16.msra.mxu1 %v1437_v4  ;;  %v1445_v9 = vpack.c.bf16 %v712_v8, %v711_v7 }
 0x146   :  { %v423_v12 = vadd.f32 %v1037_v10, %v348_v11  ;;  %v1038_v15 = vpop.f32.mrb[2].mxu1  ;;  %v1002_v16 = vadd.f32 %v1001_v14, %v1000_v13  ;;  %v713_v10 = vld [vmem:[#allocation7 + $0x70] sm:$0xff]  ;;  %v714_v11 = vld [vmem:[#allocation7 + $0x78] sm:$0xff] }
 0x147   :  { %v1039_v17 = vpop.f32.mrb[3].mxu1 }
 0x148   :  { %v1040_v18 = vadd.f32 %v1039_v17, %v1038_v15  ;;  %v353_v19 = vadd.f32 %v1002_v16, %v958_v5  ;;  %v710_v5 = vld [vmem:[#allocation7 + $0x58] sm:$0xff] }
 0x149   :  { %v1441_v6 = vpack.c.bf16 %v710_v5, %v709_v3  ;;  %v1481_v3 = vpack.c.bf16 %v854_v2, %v853_v1 }
 0x14a   :  { %v428_v20 = vadd.f32 %v1040_v18, %v353_v19 }
 0x14b   :  { %1442 = vmatprep.subr.bf16.mxu1 %v1441_v6 }
 0x14c   :  { %1444 = vmatpush3.bf16.msra.mxu1 %v1441_v6 }
 0x14d   :  { %1446 = vmatprep.subr.bf16.mxu1 %v1445_v9 }
 0x150   :  { %1448 = vmatpush3.bf16.msra.mxu1 %v1445_v9 }
 0x160   :  { %v1073_v21 = vpop.f32.mrb[4].mxu0 }
 0x161   :  { %v1074_v22 = vpop.f32.mrb[5].mxu0 }
 0x162   :  { %v1111_v23 = vpop.f32.mrb[4].mxu1  ;;  %v1075_v24 = vadd.f32 %v1074_v22, %v1073_v21  ;;  %v960_v22 = vld [vmem:[%s1793_s4] ss:$0 sm:$0xff] }
 0x163   :  { %v1112_v25 = vpop.f32.mrb[5].mxu1 }
 0x164   :  { %v1113_v26 = vadd.f32 %v1112_v25, %v1111_v23  ;;  %v498_v27 = vadd.f32 %v1075_v24, %v423_v12  ;;  %v1076_v28 = vpop.f32.mrb[6].mxu0  ;;  %v1449_v12 = vpack.c.bf16 %v714_v11, %v713_v10  ;;  %v962_v11 = vld [vmem:[%s1796_s7] ss:$0 sm:$0xff]  ;;  %s1628_s7 = smov [#allocation10]  }
 0x165   :  { %v1077_v29 = vpop.f32.mrb[7].mxu0  ;;  %s944_s21 = sshll.u32 %s1628_s7, 4  ;;  %s945_s21 = int_to_ptr.vmem [resolvable:$true] %s944_s21 }
 0x166   :  { %v1114_v30 = vpop.f32.mrb[6].mxu1  ;;  %v573_v31 = vadd.f32 %v1113_v26, %v498_v27  ;;  %v1078_v32 = vadd.f32 %v1077_v29, %v1076_v28  ;;  %1450 = vmatprep.subr.bf16.mxu1 %v1449_v12  ;;  %p1595_p5 = scmp.lt.s32.totalorder %s945_s21, %s945_s21 }
 0x167   :  { %v1115_v33 = vpop.f32.mrb[7].mxu1  ;;  %1452 = vmatpush3.bf16.msra.mxu1 %v1449_v12 }
 0x168   :  { %v1116_v34 = vadd.f32 %v1115_v33, %v1114_v30  ;;  %v503_v35 = vadd.f32 %v1078_v32, %v428_v20  ;;  %v959_v20 = vld [vmem:[%s1792_s3] ss:$0 sm:$0xff] }
 0x16a   :  { %v578_v36 = vadd.f32 %v1116_v34, %v503_v35 }
 0x180   :  { %v1149_v37 = vpop.f32.mrb[8].mxu0 }
 0x181   :  { %v1150_v38 = vpop.f32.mrb[9].mxu0 }
 0x182   :  { %v1151_v39 = vadd.f32 %v1150_v38, %v1149_v37  ;;  %v840_v37 = vld [vmem:[#allocation8 + $0x8] sm:$0xff]  ;;  %v841_v38 = vld [vmem:[#allocation8 + $0x10] sm:$0xff] }
 0x184   :  { %v1152_v40 = vpop.f32.mrb[10].mxu0  ;;  %v648_v41 = vadd.f32 %v1151_v39, %v573_v31  ;;  %v961_v31 = vld [vmem:[%s1795_s6] ss:$0 sm:$0xff] }
 0x185   :  { %v1153_v42 = vpop.f32.mrb[11].mxu0 }
 0x186   :  { %v1154_v43 = vadd.f32 %v1153_v42, %v1152_v40  ;;  %658 = vadd.xlane.f32.xlu0 %v648_v41  ;;  %v842_v40 = vld [vmem:[#allocation8 + $0x18] sm:$0xff] }
 0x188   :  { %v653_v44 = vadd.f32 %v1154_v43, %v578_v36  ;;  %v839_v36 = vld [vmem:[#allocation8] sm:$0xff] }
 0x189   :  { %v1453_v39 = vpack.c.bf16 %v840_v37, %v839_v36 }
 0x18a   :  { %660 = vadd.xlane.f32.xlu0 %v653_v44 }
 0x18b   :  { %1454 = vmatprep.subr.bf16.mxu0 %v1453_v39 }
 0x18c   :  { %1456 = vmatpush3.bf16.msra.mxu0 %v1453_v39 }
 0x213   :  { %v659_v51 = vpop.xlane.xlu0 %658 }
 0x214   :  { %v663_v52 = vmul.f32 0.0078125, %v659_v51  ;;  %v844_v51 = vld [vmem:[#allocation8 + $0x28] sm:$0xff] }
 0x216   :  { %v665_v53 = vsub.f32 %v648_v41, %v663_v52  ;;  %v1457_v41 = vpack.c.bf16 %v842_v40, %v841_v38  ;;  %v1461_v52 = vpack.c.bf16 %v844_v51, %v843_v50 }
 0x217   :  { %v661_v54 = vpop.xlane.xlu0 %660 }
 0x218   :  { %v664_v55 = vmul.f32 0.0078125, %v661_v54  ;;  %v667_v56 = vmul.f32 %v665_v53, %v665_v53  ;;  %1458 = vmatprep.subr.bf16.mxu0 %v1457_v41  ;;  %v846_v54 = vld [vmem:[#allocation8 + $0x38] sm:$0xff] }
 0x219   :  { %1460 = vmatpush3.bf16.msra.mxu0 %v1457_v41 }
 0x21a   :  { %v666_v57 = vsub.f32 %v653_v44, %v664_v55  ;;  %669 = vadd.xlane.f32.xlu1 %v667_v56  ;;  %1462 = vmatprep.subr.bf16.mxu0 %v1461_v52  ;;  %v847_v56 = vld [vmem:[#allocation8 + $0x40] sm:$0xff] }
 0x21c   :  { %v668_v58 = vmul.f32 %v666_v57, %v666_v57 }
 0x21d   :  { %1464 = vmatpush3.bf16.msra.mxu0 %v1461_v52 }
 0x21e   :  { %671 = vadd.xlane.f32.xlu1 %v668_v58  ;;  %v849_v58 = vld [vmem:[#allocation8 + $0x50] sm:$0xff] }
 0x21f   :  { %v1473_v61 = vpack.c.bf16 %v850_v60, %v849_v58 }
 0x2a7   :  { %v670_v13 = vpop.xlane.xlu1 %669 }
 0x2a8   :  { %v673_v14 = vmul.f32 0.0078125, %v670_v13 }
 0x2aa   :  { %v675_v15 = vadd.f32 1e-05, %v673_v14  ;;  %v963_v14 = vld [vmem:[%s1797_s8] ss:$0 sm:$0xff]  ;;  %s1590_s8 = scalar_lea.vmem %s945_s21, 256 }
 0x2ab   :  { %v672_v16 = vpop.xlane.xlu1 %671  ;;  %p1591_p4 = scmp.ne.s32.totalorder %s945_s21, %s1590_s8  ;;  %p1596_p6 = scmp.lt.s32.totalorder %s1590_s8, %s1590_s8 }
 0x2ac   :  { %1494 = vrsqrt.f32 %v675_v15  ;;  %v674_v17 = vmul.f32 0.0078125, %v672_v16 }
 0x2ad   :  { %p1597_p7 = por %p1596_p6, %p1595_p5 }
 0x2ae   :  { %v676_v18 = vadd.f32 1e-05, %v674_v17 }
 0x2af   :  { %p1598_p8 = pnand %p1597_p7, %p1591_p4 }
 0x2b0   :  { %1496 = vrsqrt.f32 %v676_v18 }
 0x2b6   :  { %v1495_v19 = vpop.eup %1494 }
 0x2b7   :  { %v679_v21 = vmul.f32 %v1495_v19, %v665_v53  ;;  %v845_v53 = vld [vmem:[#allocation8 + $0x30] sm:$0xff] }
 0x2b8   :  { %v1465_v55 = vpack.c.bf16 %v846_v54, %v845_v53 }
 0x2b9   :  { %v687_v23 = vmul.f32 %v959_v20, %v679_v21 }
 0x2ba   :  { %v1497_v24 = vpop.eup %1496  ;;  %1466 = vmatprep.subr.bf16.mxu0 %v1465_v55 }
 0x2bb   :  { %v680_v25 = vmul.f32 %v1497_v24, %v666_v57  ;;  %v695_v26 = vadd.f32 %v960_v22, %v687_v23  ;;  %v848_v57 = vld [vmem:[#allocation8 + $0x48] sm:$0xff]  ;;  %1468 = vmatpush3.bf16.msra.mxu0 %v1465_v55 }
 0x2bc   :  { %v1469_v59 = vpack.c.bf16 %v848_v57, %v847_v56 }
 0x2bd   :  { %v688_v27 = vmul.f32 %v959_v20, %v680_v25  ;;  %v697_v28 = vmax.f32 %v695_v26, 0.0 }
 0x2be   :  { %1470 = vmatprep.subr.bf16.mxu0 %v1469_v59 }
 0x2bf   :  { %v696_v29 = vadd.f32 %v960_v22, %v688_v27  ;;  %1223 = vmatprep.mubr.f32.mxu1 %v697_v28  ;;  %1472 = vmatpush3.bf16.msra.mxu0 %v1469_v59  ;;  %v964_v22 = vld [vmem:[%s1799_s10] ss:$0 sm:$0xff] }
 0x2c0   :  { %1474 = vmatprep.subr.bf16.mxu0 %v1473_v61 }
 0x2c1   :  { %v698_v30 = vmax.f32 %v696_v29, 0.0 }
 0x2c3   :  { %1224 = vmatmul.mubr.f32.vlgmr.msra.gmra.mrb[8].mxu1 %v698_v30  ;;  %1476 = vmatpush3.bf16.msra.mxu0 %v1473_v61 }
 0x2c4   :  { %1478 = vmatprep.subr.bf16.mxu0 %v1477_v0 }
 0x2c7   :  { %1480 = vmatpush3.bf16.msra.mxu0 %v1477_v0 }
 0x2c8   :  { %1482 = vmatprep.subr.bf16.mxu0 %v1481_v3 }
 0x2cb   :  { %1484 = vmatpush3.bf16.msra.mxu0 %v1481_v3 }
 0x396   :  { %v1225_v32 = vpop.f32.mrb[8].mxu1 }
 0x397   :  { %v794_v33 = vadd.f32 %v1225_v32, %v961_v31  ;;  %v788_v34 = vpop.f32.mrb[9].mxu1 }
 0x398   :  { %v789_v35 = vadd.f32 %v961_v31, %v788_v34 }
 0x399   :  { %801 = vadd.xlane.f32.xlu1 %v794_v33 }
 0x39a   :  { %799 = vadd.xlane.f32.xlu0 %v789_v35 }
 0x426   :  { %v802_v42 = vpop.xlane.xlu1 %801 }
 0x427   :  { %v804_v43 = vmul.f32 0.0078125, %v802_v42  ;;  %v800_v44 = vpop.xlane.xlu0 %799 }
 0x428   :  { %v803_v45 = vmul.f32 0.0078125, %v800_v44 }
 0x429   :  { %v806_v46 = vsub.f32 %v794_v33, %v804_v43 }
 0x42a   :  { %v805_v47 = vsub.f32 %v789_v35, %v803_v45 }
 0x42b   :  { %v808_v48 = vmul.f32 %v806_v46, %v806_v46 }
 0x42c   :  { %v807_v49 = vmul.f32 %v805_v47, %v805_v47 }
 0x42d   :  { %811 = vadd.xlane.f32.xlu1 %v808_v48 }
 0x42e   :  { %809 = vadd.xlane.f32.xlu0 %v807_v49 }
 0x4ba   :  { %v812_v4 = vpop.xlane.xlu1 %811 }
 0x4bb   :  { %v814_v5 = vmul.f32 0.0078125, %v812_v4  ;;  %v810_v6 = vpop.xlane.xlu0 %809 }
 0x4bc   :  { %v813_v7 = vmul.f32 0.0078125, %v810_v6 }
 0x4bd   :  { %v816_v8 = vadd.f32 1e-05, %v814_v5 }
 0x4be   :  { %v815_v9 = vadd.f32 1e-05, %v813_v7 }
 0x4bf   :  { %1498 = vrsqrt.f32 %v816_v8 }
 0x4c0   :  { %1500 = vrsqrt.f32 %v815_v9 }
 0x4c9   :  { %v1499_v10 = vpop.eup %1498 }
 0x4ca   :  { %v1501_v12 = vpop.eup %1500  ;;  %v820_v13 = vmul.f32 %v1499_v10, %v806_v46 }
 0x4cb   :  { %v819_v15 = vmul.f32 %v1501_v12, %v805_v47 }
 0x4cc   :  { %v828_v16 = vmul.f32 %v962_v11, %v820_v13 }
 0x4cd   :  { %v827_v17 = vmul.f32 %v962_v11, %v819_v15 }
 0x4ce   :  { %v836_v18 = vadd.f32 %v963_v14, %v828_v16 }
 0x4cf   :  { %v835_v19 = vadd.f32 %v963_v14, %v827_v17 }
 0x4d0   :  { %v838_v21 = vmax.f32 %v836_v18, 0.0 }
 0x4d1   :  { %v837_v20 = vmax.f32 %v835_v19, 0.0 }
 0x4d3   :  { %1258 = vmatprep.mubr.f32.mxu0 %v837_v20 }
 0x4d4   :  { %1259 = vmatmul.mubr.f32.vlgmr.msra.gmra.mrb[12].mxu0 %v838_v21 }
 0x5a7   :  { %v1260_v23 = vpop.f32.mrb[12].mxu0 }
 0x5a8   :  { %v934_v24 = vadd.f32 %v1260_v23, %v964_v22  ;;  %v928_v25 = vpop.f32.mrb[13].mxu0 }
 0x5a9   :  { %v929_v26 = vadd.f32 %v964_v22, %v928_v25 }
 0x5aa   :  { %938 = vst [vmem:[#allocation10 + $0x8] sm:$0xff] %v934_v24 }
 0x5ab   :  { %937 = vst [vmem:[#allocation10] sm:$0xff] %v929_v26 }
 0x5ac   :  { %1601 = shalt.err (!%p1598_p8)
}
 0x5ad   :  { %s1602_s10 = scalar_lea.hbm %s1800_s11, 256 }
 0x5ae   :  { %p1603_p9 = scmp.ne.s32.totalorder %s1800_s11, %s1602_s10  ;;  %p1606_p10 = scmp.lt.u32.totalorder %s1602_s10, %s1800_s11 }
 0x5b0   :  { %p1608_p11 = pnand %p1606_p10, %p1603_p9 }
 0x5b2   :  { %1611 = shalt.err (!%p1608_p11)
}
 0x5b3   :  { %950 = dma.vmem_to_hbm [thread:$0]  %s945_s21, 256, %s1800_s11, [#allocation4], %s1621_s27, %s1621_s27, %s1622_s28  }
 0x5b4   :  { %1618 = dma.done.wait [#allocation4], 256  }
 0x5b5   :  { %1619 = vsyncadd [#allocation4], 4294967040 }
 0x5b6   :  { %954 = vsyncpa [#allocation3], 1 }
 0x5b7   :  { %955 = vsyncpa [#allocation6], 1 }
 0x5b8   :  { %956 = vsyncpa [#allocation9], 1 }
 0x5b9   :  { %957 = vsyncpa [#allocation4], 1 }

</bundles_post_ra>
